<compile_context>
chip_gen: v5e
topology: v5e:2x2
jax: 0.10.0
libtpu: 0.0.40
codegen_flags: <defaults>
</compile_context>

<pallas_src>
import functools

import jax
import jax.numpy as jnp
from jax.experimental import pallas as pl
from jax.experimental.pallas import tpu as pltpu

_LANE = 128
_SUBLANE = 8
_MAX_COLS = 8192
_SPLIT_BYTES = 1 * 1024 * 1024  # only split a single block into 2 steps above this


def _silu_kernel(x_ref, o_ref, *, compute_dtype):
    x = x_ref[...].astype(compute_dtype)
    # One EUP transcendental + one divide (no two-exp / select expansion).
    # pl.reciprocal(..., approx=True) is a further v7x-only knob; it is left
    # off so the f32 path stays within tight numerical tolerance.
    sig = 1.0 / (1.0 + jnp.exp(-x))
    o_ref[...] = (x * sig).astype(o_ref.dtype)


def _vmem_budget():
    """(block_bytes, vmem_limit_bytes) chosen from the chip's VMEM capacity."""
    vmem_cap = None
    try:
        info = pltpu.get_tpu_info()
        vmem_cap = getattr(info, "vmem_capacity_bytes", None)
    except Exception:
        vmem_cap = None
    if vmem_cap is not None and vmem_cap >= 100 * 1024 * 1024:
        # v5e / v6e: 128 MiB physical VMEM per TensorCore.
        return 8 * 1024 * 1024, 64 * 1024 * 1024
    # v7x (64 MiB per TC) or unknown: stay conservative.
    return 4 * 1024 * 1024, 40 * 1024 * 1024


def _choose_2d_shape(total):
    """Pick a (rows, cols, pad) flattening for `total` elements.

    Preference order:
      1. lane-dense cols (multiple of 128) dividing total, with rows >= 8
      2. lane-dense cols dividing total (rows < 8: tensor is tiny)
      3. any full-extent divisor cols in [128, 8192] (ragged, zero-copy),
         preferring one that leaves rows >= 8
      4. pad the tail to a multiple of 128 (pathological sizes only)
    """
    lane_dense_fallback = None
    for c in (_MAX_COLS, 4096, 2048, 1024, 512, 256, _LANE):
        if total % c == 0:
            rows = total // c
            if rows >= _SUBLANE:
                return rows, c, 0
            if lane_dense_fallback is None:
                lane_dense_fallback = (rows, c, 0)
    if lane_dense_fallback is not None:
        return lane_dense_fallback

    # total is not a multiple of 128: look for a zero-copy divisor (no pad).
    best = None
    best_rows8 = None
    d = 1
    while d * d <= total:
        if total % d == 0:
            for c in (d, total // d):
                if _LANE <= c <= _MAX_COLS:
                    if best is None or c > best:
                        best = c
                    if total // c >= _SUBLANE and (best_rows8 is None or c > best_rows8):
                        best_rows8 = c
        d += 1
    c = best_rows8 if best_rows8 is not None else best
    if c is not None:
        return total // c, c, 0

    # Last resort (e.g. near-prime numel): pad up to a multiple of 128.
    padded = pl.cdiv(total, _LANE) * _LANE
    return padded // _LANE, _LANE, padded - total


def silu_pallas(x: jax.Array) -> jax.Array:
    """Elementwise SiLU on an arbitrary-shape tensor via a Pallas TPU kernel."""
    orig_shape = x.shape
    dtype = x.dtype
    total = x.size
    if total == 0:
        return x
    dtype_bytes = jnp.dtype(dtype).itemsize
    # Dtype-matched compute: keep bf16 narrow (v6e/v7x bf16 VPU/EUP); anything
    # else computes in f32.
    compute_dtype = jnp.bfloat16 if dtype == jnp.dtype(jnp.bfloat16) else jnp.float32

    rows, cols, pad = _choose_2d_shape(total)
    flat = x.reshape(-1)
    if pad:
        # Rare fallback only; SiLU(0) == 0 so zero-padding is exact.
        flat = jnp.pad(flat, (0, pad))
    x2d = flat.reshape(rows, cols)

    block_bytes, vmem_limit = _vmem_budget()
    budget_rows = max(
        _SUBLANE,
        (block_bytes // (cols * dtype_bytes)) // _SUBLANE * _SUBLANE,
    )
    if rows <= budget_rows:
        tile_rows = rows  # full extent: always a legal block shape
        # Only split a single block into >= 2 grid steps when it is large
        # enough that the ~0.35us/step cost is negligible (lets both v7x
        # TensorCores stream under dimension_semantics=("parallel",)).
        if rows * cols * dtype_bytes >= _SPLIT_BYTES and rows >= 2 * _SUBLANE:
            tile_rows = pl.cdiv(pl.cdiv(rows, 2), _SUBLANE) * _SUBLANE
    else:
        tile_rows = budget_rows  # multiple of 8; last partial block is masked

    grid = (pl.cdiv(rows, tile_rows),)
    kernel = functools.partial(_silu_kernel, compute_dtype=compute_dtype)

    out2d = pl.pallas_call(
        kernel,
        out_shape=jax.ShapeDtypeStruct((rows, cols), dtype),
        grid_spec=pltpu.PrefetchScalarGridSpec(
            num_scalar_prefetch=0,
            grid=grid,
            in_specs=[pl.BlockSpec((tile_rows, cols), lambda i: (i, 0))],
            out_specs=pl.BlockSpec((tile_rows, cols), lambda i: (i, 0)),
        ),
        compiler_params=pltpu.CompilerParams(
            # TODO(synk): if an xprof trace shows one idle TensorCore on v7x,
            # switch to pltpu.CORE_PARALLEL on an explicit leading axis.
            dimension_semantics=("parallel",),
            vmem_limit_bytes=vmem_limit,
        ),
    )(x2d)

    out_flat = out2d.reshape(-1)
    if pad:
        out_flat = out_flat[:total]
    return out_flat.reshape(orig_shape)


if __name__ == "__main__":
    key = jax.random.PRNGKey(0)

    # Small NCHW activation consistent with a YOLO-style SiLU: (2, 4, 16, 16).
    x = jax.random.normal(key, (2, 4, 16, 16), dtype=jnp.float32)
    y = silu_pallas(x)
    jax.block_until_ready(y)
    y_ref = x * jax.nn.sigmoid(x)
    assert y.shape == x.shape and y.dtype == x.dtype
    assert jnp.allclose(y, y_ref, atol=1e-5, rtol=1e-5)

    # Ragged shape (numel not a multiple of 128) -> zero-copy divisor path.
    x2 = jax.random.normal(jax.random.PRNGKey(1), (2, 3, 13, 13), dtype=jnp.float32)
    y2 = silu_pallas(x2)
    jax.block_until_ready(y2)
    assert jnp.allclose(y2, x2 * jax.nn.sigmoid(x2), atol=1e-5, rtol=1e-5)

    # bf16 input -> dtype-matched (bf16) compute path.
    x3 = jax.random.normal(jax.random.PRNGKey(2), (2, 4, 16, 16), dtype=jnp.bfloat16)
    y3 = silu_pallas(x3)
    jax.block_until_ready(y3)
    x3f = x3.astype(jnp.float32)
    y3_ref = (x3f * jax.nn.sigmoid(x3f)).astype(jnp.bfloat16)
    assert y3.dtype == jnp.bfloat16
    assert jnp.allclose(
        y3.astype(jnp.float32), y3_ref.astype(jnp.float32), atol=5e-2, rtol=5e-2
    )

    # TODO(synk): inplace=True semantics (input.copy_) have no meaning for
    # immutable JAX arrays; an input_output_aliases={0: 0} variant could reuse
    # the input buffer but does not change HBM traffic, so it is omitted.
    print("KERNEL_OK")
</pallas_src>

<mosaic_0001>
module attributes {stable_mosaic.version = 11 : i64} {
  func.func @_silu_kernel(%arg0: i32, %arg1: memref<8x256xf32, #tpu.memory_space<vmem>>, %arg2: memref<8x256xf32, #tpu.memory_space<vmem>>) attributes {dimension_semantics = [#tpu.dimension_semantics<parallel>], iteration_bounds = array<i64: 1>, scalar_prefetch = 0 : i64, scratch_operands = 0 : i64, tpu.core_type = #tpu.core_type<tc>, window_params = [{transform_indices = @transform_0, window_bounds = array<i64: 8, 256>}, {transform_indices = @transform_1, window_bounds = array<i64: 8, 256>}]} {
    %c0 = arith.constant 0 : index
    %c0_0 = arith.constant 0 : index
    %0 = vector.load %arg1[%c0, %c0_0] : memref<8x256xf32, #tpu.memory_space<vmem>>, vector<8x256xf32>
    %cst = arith.constant 0.000000e+00 : f32
    %1 = vector.broadcast %cst : f32 to vector<8x256xf32>
    %2 = arith.subf %1, %0 : vector<8x256xf32>
    %3 = math.exp %2 : vector<8x256xf32>
    %cst_1 = arith.constant 1.000000e+00 : f32
    %4 = vector.broadcast %cst_1 : f32 to vector<8x256xf32>
    %5 = arith.addf %4, %3 : vector<8x256xf32>
    %cst_2 = arith.constant 1.000000e+00 : f32
    %6 = vector.broadcast %cst_2 : f32 to vector<8x256xf32>
    %7 = arith.divf %6, %5 : vector<8x256xf32>
    %8 = arith.mulf %0, %7 : vector<8x256xf32>
    %c0_3 = arith.constant 0 : index
    %c0_4 = arith.constant 0 : index
    %9 = vector.load %arg2[%c0_3, %c0_4] : memref<8x256xf32, #tpu.memory_space<vmem>>, vector<8x256xf32>
    tpu.vector_store %arg2[%c0_3, %c0_4], %8 {strides = array<i32>} : memref<8x256xf32, #tpu.memory_space<vmem>>, vector<8x256xf32>,
    return
  }
  func.func @transform_0(%arg0: i32) -> (i32, i32) {
    %c0_i32 = arith.constant 0 : i32
    %c0_i32_0 = arith.constant 0 : i32
    return %arg0, %c0_i32 : i32, i32
  }
  func.func @transform_1(%arg0: i32) -> (i32, i32) {
    %c0_i32 = arith.constant 0 : i32
    %c0_i32_0 = arith.constant 0 : i32
    return %arg0, %c0_i32 : i32, i32
  }
}

</mosaic_0001>

<bundles_post_ra>
// kernel: tpu_custom_call.1
= control target key start
LH: loop header
LB: loop body
LE: loop exit
PB: predicated region body
PF: predicated region fallthrough
CT: control target
= control target key end

     0   :  { %6 = vsyncpa [#allocation3], 0  ;;  %s164_s0 = inlined_call_operand.hbm [shape: f32[8,256], index: 0, kind: input, shape index: {}]   ;;  %s165_s1 = inlined_call_operand.hbm [shape: f32[8,256], index: 1, kind: output, shape index: {}]  }
   0x1   :  { %7 = vsyncpa [#allocation4], 0  ;;  %s13_s8 = sshll.u32 %s164_s0, 4  ;;  %s146_s9 = smov [#allocation2]   ;;  %s14_s8 = int_to_ptr.hbm [resolvable:$true] %s13_s8 }
   0x2   :  { %s15_s10 = sshll.u32 %s146_s9, 4  ;;  %s16_s10 = int_to_ptr.vmem [resolvable:$true] %s15_s10 }
   0x3   :  { %18 = dma.hbm_to_vmem [thread:$0]  %s14_s8, 256, %s16_s10, [#allocation3]  }
   0x4   :  { %142 = dma.done.wait [#allocation3], 256  }
   0x5   :  { %143 = vsyncadd [#allocation3], 4294967040  ;;  %v23_v0 = vld [vmem:[#allocation2] sm:$0xff]  ;;  %v24_v1 = vld [vmem:[#allocation2 + $0x8] sm:$0xff]  ;;  %s147_s0 = smov [#allocation5]   ;;  %s74_s14 = sshll.u32 %s165_s1, 4  ;;  %s75_s14 = int_to_ptr.hbm [resolvable:$true] %s74_s14 }
   0x6   :  { %v25_v2 = vsub.f32 0.0, %v23_v0  ;;  %v26_v3 = vsub.f32 0.0, %v24_v1  ;;  %s72_s11 = sshll.u32 %s147_s0, 4  ;;  %s73_s11 = int_to_ptr.vmem [resolvable:$true] %s72_s11 }
   0x8   :  { %v27_v4 = vmul.f32 1.442695, %v25_v2  ;;  %v29_v5 = vmul.f32 1.442695, %v26_v3 }
   0xa   :  { %86 = vpow2.f32 %v27_v4 }
   0xb   :  { %88 = vpow2.f32 %v29_v5 }
  0x10   :  { %v87_v6 = vpop.eup %86 }
  0x11   :  { %v89_v7 = vpop.eup %88  ;;  %v31_v8 = vadd.f32 1.0, %v87_v6 }
  0x12   :  { %v32_v9 = vadd.f32 1.0, %v89_v7 }
  0x13   :  { %90 = vrcp.f32 %v31_v8  ;;  %vm38_vm0 = vweird.f32 %v31_v8  ;;  %v44_v13 = vand.u32 2147483648, %v31_v8  ;;  %v42_v16 = vand.u32 2147483647, %v31_v8 }
  0x14   :  { %92 = vrcp.f32 %v32_v9  ;;  %v59_v17 = vand.u32 2147483648, %v32_v9  ;;  %vm53_vm2 = vweird.f32 %v32_v9  ;;  %v57_v19 = vand.u32 2147483647, %v32_v9 }
  0x15   :  { %v45_v21 = vor.u32 1.1754944e-38, %v44_v13  ;;  %vm43_vm5 = vcmp.eq.f32.partialorder %v42_v16, 8.507059e+37 }
  0x16   :  { %v60_v24 = vor.u32 1.1754944e-38, %v59_v17  ;;  %vm58_vm7 = vcmp.eq.f32.partialorder %v57_v19, 8.507059e+37 }
  0x19   :  { %v91_v10 = vpop.eup %90 }
  0x1a   :  { %v93_v11 = vpop.eup %92  ;;  %v34_v12 = vmul.f32 %v91_v10, %v31_v8  ;;  %vm39_vm1 = vweird.f32 %v91_v10 }
  0x1b   :  { %v49_v14 = vmul.f32 %v93_v11, %v32_v9  ;;  %vm54_vm3 = vweird.f32 %v93_v11  ;;  %vm40_vm4 = vmor %vm38_vm0, %vm39_vm1 }
  0x1c   :  { %v35_v15 = vsub.f32 1.0, %v34_v12  ;;  %vm55_vm6 = vmor %vm53_vm2, %vm54_vm3 }
  0x1d   :  { %v50_v18 = vsub.f32 1.0, %v49_v14 }
  0x1e   :  { %v36_v20 = vmul.f32 %v91_v10, %v35_v15 }
  0x1f   :  { %v51_v22 = vmul.f32 %v93_v11, %v50_v18 }
  0x20   :  { %v37_v23 = vadd.f32 %v91_v10, %v36_v20 }
  0x21   :  { %v52_v25 = vadd.f32 %v93_v11, %v51_v22 }
  0x22   :  { %v41_v26 = vsel %vm40_vm4, %v91_v10, %v37_v23 }
  0x23   :  { %v46_v27 = vsel %vm43_vm5, %v45_v21, %v41_v26  ;;  %v56_v28 = vsel %vm55_vm6, %v93_v11, %v52_v25 }
  0x24   :  { %v63_v29 = vmul.f32 %v46_v27, %v23_v0  ;;  %v61_v30 = vsel %vm58_vm7, %v60_v24, %v56_v28 }
  0x25   :  { %v64_v31 = vmul.f32 %v61_v30, %v24_v1 }
  0x26   :  { %65 = vst [vmem:[#allocation5] sm:$0xff] %v63_v29 }
  0x27   :  { %66 = vst [vmem:[#allocation5 + $0x8] sm:$0xff] %v64_v31 }
  0x28   :  { %77 = dma.vmem_to_hbm [thread:$0]  %s73_s11, 256, %s75_s14, [#allocation4]  }
  0x29   :  { %144 = dma.done.wait [#allocation4], 256  }
  0x2a   :  { %145 = vsyncadd [#allocation4], 4294967040 }
  0x2b   :  { %82 = vsyncpa [#allocation3], 1 }
  0x2c   :  { %83 = vsyncpa [#allocation4], 1 }

</bundles_post_ra>
